<compile_context>
chip_gen: v5e
topology: v5e:2x2
jax: 0.10.0
libtpu: 0.0.40
codegen_flags: <defaults>
</compile_context>

<pallas_src>
import jax
import jax.numpy as jnp
from jax import lax
from jax.experimental import pallas as pl
from jax.experimental.pallas import tpu as pltpu


def attention_kernel(x_ref, w_ref, o_ref, m_sc, l_sc, acc_sc):
    # x_ref: (TILE_N, D), w_ref: (D, 1), o_ref: (1, D)
    # m_sc/l_sc: (1, 1) f32, acc_sc: (1, D) f32   (resident across the grid)
    i = pl.program_id(0)

    @pl.when(i == 0)
    def _init():
        m_sc[...] = jnp.full(m_sc.shape, -jnp.inf, dtype=m_sc.dtype)
        l_sc[...] = jnp.zeros(l_sc.shape, dtype=l_sc.dtype)
        acc_sc[...] = jnp.zeros(acc_sc.shape, dtype=acc_sc.dtype)

    # Keep all softmax math in f32 (v5e has no bf16 VPU/EUP path).
    x = x_ref[...].astype(jnp.float32)                       # (TILE_N, D)

    # scores = x @ w  (Linear bias omitted: softmax shift-invariance)
    s = jnp.dot(x, w_ref[...].astype(jnp.float32),
                preferred_element_type=jnp.float32)          # (TILE_N, 1)

    # Online-softmax (flash-style) rescale of the running accumulators.
    m_prev = m_sc[...]                                       # (1, 1)
    m_new = jnp.maximum(m_prev, jnp.max(s, axis=0, keepdims=True))
    alpha = jnp.exp(m_prev - m_new)                          # (1, 1)
    e = jnp.exp(s - m_new)                                   # (TILE_N, 1)

    l_sc[...] = alpha * l_sc[...] + jnp.sum(e, axis=0, keepdims=True)

    # Weighted row-sum as a contraction over N on the MXU:
    #   (TILE_N, 1) x (TILE_N, D) --contract dim 0--> (1, D)
    part = lax.dot_general(e, x, (((0,), (0,)), ((), ())),
                           preferred_element_type=jnp.float32)
    acc_sc[...] = alpha * acc_sc[...] + part
    m_sc[...] = m_new

    @pl.when(i == pl.num_programs(0) - 1)
    def _finalize():
        # Exact reciprocal: single (1, 1) value, negligible cost, and keeps the
        # strict 1e-5 tolerance vs the reference (approx=True would relax it).
        inv_l = pl.reciprocal(l_sc[...], approx=False)
        o_ref[...] = (acc_sc[...] * inv_l).astype(o_ref.dtype)


def _choose_tile_n(n, d, itemsize, tile_budget_bytes=8 << 20):
    """Largest TILE_N that divides N, is a multiple of 8 (or == N), and keeps
    one x tile within ~tile_budget_bytes so double-buffered tiles fit scoped
    VMEM on every TPU generation (incl. v7x's 64 MiB physical VMEM)."""
    max_rows = max(8, tile_budget_bytes // max(1, d * itemsize))
    if n <= max_rows:
        return n
    for t in range(min(n, max_rows), 0, -1):
        if n % t == 0 and (t % 8 == 0 or t == n):
            return t
    return n


def attention_layer(x, w, b=None):
    """x: (N, D), w: (D, 1), b: (1, 1) -> (1, D).

    Computes softmax((x @ w + b).reshape(1, -1), axis=1) @ x. The bias is
    ignored inside the kernel because softmax is shift-invariant.
    """
    del b  # algebraic no-op under the softmax; dead compute/DMA removed.
    N, D = x.shape
    tile_n = _choose_tile_n(N, D, x.dtype.itemsize)
    grid = (N // tile_n,)

    return pl.pallas_call(
        attention_kernel,
        out_shape=jax.ShapeDtypeStruct((1, D), x.dtype),
        grid=grid,
        in_specs=[
            pl.BlockSpec((tile_n, D), lambda i: (i, 0)),   # stream x over N
            pl.BlockSpec((D, 1), lambda i: (0, 0)),        # w resident
        ],
        out_specs=pl.BlockSpec((1, D), lambda i: (0, 0)),  # resident accumulator
        scratch_shapes=[
            pltpu.VMEM((1, 1), jnp.float32),   # running max  m
            pltpu.VMEM((1, 1), jnp.float32),   # running denom l
            pltpu.VMEM((1, D), jnp.float32),   # running numerator acc
        ],
        compiler_params=pltpu.CompilerParams(
            dimension_semantics=("arbitrary",),   # sequential N-reduction axis
            vmem_limit_bytes=48 << 20,            # within v7x 64 MiB physical
        ),
    )(x, w)


def attention_layer_ref(x, w, b):
    scores = x @ w + b[0, 0]                      # (N, 1)
    s = scores.reshape(1, -1)                     # (1, N)
    weight = jax.nn.softmax(s, axis=1)            # (1, N)
    return weight @ x                             # (1, D)


if __name__ == "__main__":
    N, D = 8, 32  # seq=8 tokens, embedding_dim=32

    key = jax.random.PRNGKey(0)
    kx, kw, kb = jax.random.split(key, 3)

    x = jax.random.normal(kx, (N, D), dtype=jnp.float32)
    # nn.Linear(D, 1): weight (1, D), bias (1,) — stored transposed as (D, 1)
    bound = 1.0 / (D ** 0.5)
    w = jax.random.uniform(kw, (D, 1), minval=-bound, maxval=bound,
                           dtype=jnp.float32)
    b = jax.random.uniform(kb, (1, 1), minval=-bound, maxval=bound,
                           dtype=jnp.float32)

    out = attention_layer(x, w, b)
    out = jax.block_until_ready(out)

    ref = attention_layer_ref(x, w, b)
    assert out.shape == (1, D)
    assert jnp.allclose(out, ref, atol=1e-5, rtol=1e-5), (out, ref)

    print("KERNEL_OK")
</pallas_src>

<mosaic_0001>
module attributes {stable_mosaic.version = 11 : i64} {
  func.func @attention_kernel(%arg0: i32, %arg1: memref<8x32xf32, #tpu.memory_space<vmem>>, %arg2: memref<32x1xf32, #tpu.memory_space<vmem>>, %arg3: memref<1x32xf32, #tpu.memory_space<vmem>>, %arg4: memref<1x1xf32, #tpu.memory_space<vmem>>, %arg5: memref<1x1xf32, #tpu.memory_space<vmem>>, %arg6: memref<1x32xf32, #tpu.memory_space<vmem>>) attributes {dimension_semantics = [#tpu.dimension_semantics<arbitrary>], iteration_bounds = array<i64: 1>, scalar_prefetch = 0 : i64, scratch_operands = 3 : i64, tpu.core_type = #tpu.core_type<tc>, window_params = [{transform_indices = @transform_0, window_bounds = array<i64: 8, 32>}, {pipeline_mode = #tpu.pipeline_mode<synchronous>, transform_indices = @transform_1, window_bounds = array<i64: 32, 1>}, {pipeline_mode = #tpu.pipeline_mode<synchronous>, transform_indices = @transform_2, window_bounds = array<i64: 1, 32>}]} {
    %c0_i32 = arith.constant 0 : i32
    %0 = arith.cmpi eq, %arg0, %c0_i32 : i32
    %1 = arith.extui %0 : i1 to i32
    %c0_i32_0 = arith.constant 0 : i32
    %2 = arith.cmpi ne, %1, %c0_i32_0 : i32
    scf.if %2 {
      %cst_21 = arith.constant 0xFF800000 : f32
      %31 = vector.broadcast %cst_21 : f32 to vector<1x1xf32>
      %c0_22 = arith.constant 0 : index
      %c0_23 = arith.constant 0 : index
      %32 = vector.load %arg4[%c0_22, %c0_23] : memref<1x1xf32, #tpu.memory_space<vmem>>, vector<1x1xf32>
      tpu.vector_store %arg4[%c0_22, %c0_23], %31 {strides = array<i32>} : memref<1x1xf32, #tpu.memory_space<vmem>>, vector<1x1xf32>,
      %cst_24 = arith.constant 0.000000e+00 : f32
      %33 = vector.broadcast %cst_24 : f32 to vector<1x1xf32>
      %c0_25 = arith.constant 0 : index
      %c0_26 = arith.constant 0 : index
      %34 = vector.load %arg5[%c0_25, %c0_26] : memref<1x1xf32, #tpu.memory_space<vmem>>, vector<1x1xf32>
      tpu.vector_store %arg5[%c0_25, %c0_26], %33 {strides = array<i32>} : memref<1x1xf32, #tpu.memory_space<vmem>>, vector<1x1xf32>,
      %cst_27 = arith.constant 0.000000e+00 : f32
      %35 = vector.broadcast %cst_27 : f32 to vector<1x32xf32>
      %c0_28 = arith.constant 0 : index
      %c0_29 = arith.constant 0 : index
      %36 = vector.load %arg6[%c0_28, %c0_29] : memref<1x32xf32, #tpu.memory_space<vmem>>, vector<1x32xf32>
      tpu.vector_store %arg6[%c0_28, %c0_29], %35 {strides = array<i32>} : memref<1x32xf32, #tpu.memory_space<vmem>>, vector<1x32xf32>,
    } else {
    }
    %c0 = arith.constant 0 : index
    %c0_1 = arith.constant 0 : index
    %3 = vector.load %arg1[%c0, %c0_1] : memref<8x32xf32, #tpu.memory_space<vmem>>, vector<8x32xf32>
    %c0_2 = arith.constant 0 : index
    %c0_3 = arith.constant 0 : index
    %4 = vector.load %arg2[%c0_2, %c0_3] : memref<32x1xf32, #tpu.memory_space<vmem>>, vector<32x1xf32>
    %cst = arith.constant dense<0.000000e+00> : vector<8x1xf32>
    %5 = tpu.matmul %3, %4, %cst {dimension_numbers = #tpu.dot_dimension_numbers<[1], [0], [0], [1], [0, 0, 1, 1], [], []>} : vector<8x32xf32>, vector<32x1xf32>, vector<8x1xf32> -> vector<8x1xf32>
    %c0_4 = arith.constant 0 : index
    %c0_5 = arith.constant 0 : index
    %6 = vector.load %arg4[%c0_4, %c0_5] : memref<1x1xf32, #tpu.memory_space<vmem>>, vector<1x1xf32>
    %cst_6 = arith.constant dense<0xFF800000> : vector<1xf32>
    %7 = vector.multi_reduction <maximumf>, %5, %cst_6 [0] : vector<8x1xf32> to vector<1xf32>
    %8 = vector.shape_cast %7 : vector<1xf32> to vector<1x1xf32>
    %9 = arith.maximumf %6, %8 : vector<1x1xf32>
    %10 = arith.subf %6, %9 : vector<1x1xf32>
    %11 = math.exp %10 : vector<1x1xf32>
    %12 = vector.broadcast %9 : vector<1x1xf32> to vector<8x1xf32>
    %13 = arith.subf %5, %12 : vector<8x1xf32>
    %14 = math.exp %13 : vector<8x1xf32>
    %c0_7 = arith.constant 0 : index
    %c0_8 = arith.constant 0 : index
    %15 = vector.load %arg5[%c0_7, %c0_8] : memref<1x1xf32, #tpu.memory_space<vmem>>, vector<1x1xf32>
    %16 = arith.mulf %11, %15 : vector<1x1xf32>
    %cst_9 = arith.constant dense<0.000000e+00> : vector<1xf32>
    %17 = vector.multi_reduction <add>, %14, %cst_9 [0] : vector<8x1xf32> to vector<1xf32>
    %18 = vector.shape_cast %17 : vector<1xf32> to vector<1x1xf32>
    %19 = arith.addf %16, %18 : vector<1x1xf32>
    %c0_10 = arith.constant 0 : index
    %c0_11 = arith.constant 0 : index
    %20 = vector.load %arg5[%c0_10, %c0_11] : memref<1x1xf32, #tpu.memory_space<vmem>>, vector<1x1xf32>
    tpu.vector_store %arg5[%c0_10, %c0_11], %19 {strides = array<i32>} : memref<1x1xf32, #tpu.memory_space<vmem>>, vector<1x1xf32>,
    %cst_12 = arith.constant dense<0.000000e+00> : vector<1x32xf32>
    %21 = tpu.matmul %14, %3, %cst_12 {dimension_numbers = #tpu.dot_dimension_numbers<[0], [0], [1], [1], [0, 1, 1, 1], [], []>} : vector<8x1xf32>, vector<8x32xf32>, vector<1x32xf32> -> vector<1x32xf32>
    %c0_13 = arith.constant 0 : index
    %c0_14 = arith.constant 0 : index
    %22 = vector.load %arg6[%c0_13, %c0_14] : memref<1x32xf32, #tpu.memory_space<vmem>>, vector<1x32xf32>
    %23 = vector.broadcast %11 : vector<1x1xf32> to vector<1x32xf32>
    %24 = arith.mulf %23, %22 : vector<1x32xf32>
    %25 = arith.addf %24, %21 : vector<1x32xf32>
    %c0_15 = arith.constant 0 : index
    %c0_16 = arith.constant 0 : index
    %26 = vector.load %arg6[%c0_15, %c0_16] : memref<1x32xf32, #tpu.memory_space<vmem>>, vector<1x32xf32>
    tpu.vector_store %arg6[%c0_15, %c0_16], %25 {strides = array<i32>} : memref<1x32xf32, #tpu.memory_space<vmem>>, vector<1x32xf32>,
    %c0_17 = arith.constant 0 : index
    %c0_18 = arith.constant 0 : index
    %27 = vector.load %arg4[%c0_17, %c0_18] : memref<1x1xf32, #tpu.memory_space<vmem>>, vector<1x1xf32>
    tpu.vector_store %arg4[%c0_17, %c0_18], %9 {strides = array<i32>} : memref<1x1xf32, #tpu.memory_space<vmem>>, vector<1x1xf32>,
    %c0_i32_19 = arith.constant 0 : i32
    %28 = arith.cmpi eq, %arg0, %c0_i32_19 : i32
    %29 = arith.extui %28 : i1 to i32
    %c0_i32_20 = arith.constant 0 : i32
    %30 = arith.cmpi ne, %29, %c0_i32_20 : i32
    scf.if %30 {
      %c0_21 = arith.constant 0 : index
      %c0_22 = arith.constant 0 : index
      %31 = vector.load %arg5[%c0_21, %c0_22] : memref<1x1xf32, #tpu.memory_space<vmem>>, vector<1x1xf32>
      %32 = tpu.reciprocal %31 : vector<1x1xf32> -> vector<1x1xf32>
      %c0_23 = arith.constant 0 : index
      %c0_24 = arith.constant 0 : index
      %33 = vector.load %arg6[%c0_23, %c0_24] : memref<1x32xf32, #tpu.memory_space<vmem>>, vector<1x32xf32>
      %34 = vector.broadcast %32 : vector<1x1xf32> to vector<1x32xf32>
      %35 = arith.mulf %33, %34 : vector<1x32xf32>
      %c0_25 = arith.constant 0 : index
      %c0_26 = arith.constant 0 : index
      %36 = vector.load %arg3[%c0_25, %c0_26] : memref<1x32xf32, #tpu.memory_space<vmem>>, vector<1x32xf32>
      tpu.vector_store %arg3[%c0_25, %c0_26], %35 {strides = array<i32>} : memref<1x32xf32, #tpu.memory_space<vmem>>, vector<1x32xf32>,
    } else {
    }
    return
  }
  func.func @transform_0(%arg0: i32) -> (i32, i32) {
    %c0_i32 = arith.constant 0 : i32
    %c0_i32_0 = arith.constant 0 : i32
    return %arg0, %c0_i32 : i32, i32
  }
  func.func @transform_1(%arg0: i32) -> (i32, i32) {
    %c0_i32 = arith.constant 0 : i32
    %c0_i32_0 = arith.constant 0 : i32
    %c0_i32_1 = arith.constant 0 : i32
    return %c0_i32, %c0_i32_0 : i32, i32
  }
  func.func @transform_2(%arg0: i32) -> (i32, i32) {
    %c0_i32 = arith.constant 0 : i32
    %c0_i32_0 = arith.constant 0 : i32
    %c0_i32_1 = arith.constant 0 : i32
    return %c0_i32, %c0_i32_0 : i32, i32
  }
}

</mosaic_0001>

<bundles_post_ra>
// kernel: tpu_custom_call.1
= control target key start
LH: loop header
LB: loop body
LE: loop exit
PB: predicated region body
PF: predicated region fallthrough
CT: control target
= control target key end

     0   :  { %vm16_vm0 = vcmask 0   ;;  %v232_v3 = vmov -inf   ;;  %v233_v5 = vmov 0.0   ;;  %s280_s0 = inlined_call_operand.vmem [shape: f32[8,32], index: 0, kind: input, shape index: {}]   ;;  %s281_s1 = inlined_call_operand.vmem [shape: f32[32,1], index: 1, kind: input, shape index: {}]   ;;  %s282_s2 = inlined_call_operand.hbm [shape: f32[1,32], index: 2, kind: output, shape index: {}]  }
   0x1   :  { %v25_v0 = vld [vmem:[%s281_s1 + $0x18] sm:$0xff]  ;;  %v24_v1 = vld [vmem:[%s281_s1 + $0x10] sm:$0xff]  ;;  %v21_v2 = vld [vmem:[%s280_s0] sm:$0xff]  ;;  %17 = vst.msk [vmem:[#allocation2] sm:$0x1] %vm16_vm0, %v232_v3 }
   0x2   :  { %42 = vmatpush.msra.mxu0 %v25_v0  ;;  %v23_v4 = vld [vmem:[%s281_s1 + $0x8] sm:$0xff]  ;;  %18 = vst.msk [vmem:[#allocation3] sm:$0x1] %vm16_vm0, %v233_v5  ;;  %132 = vmatpush.msra.mxu1 %v21_v2 }
   0x3   :  { %7 = vsyncpa [#allocation6], 0  ;;  %v22_v6 = vld [vmem:[%s281_s1] sm:$0xff]  ;;  %vm26_vm1 = vcmask 261120   ;;  %vm51_vm2 = vcmask 7168   ;;  %v234_v16 = vmov 0  }
   0x4   :  { %43 = vmatpush.msra.mxu0 %v24_v1  ;;  %199 = vset.pattern.permute.xlu1 %v234_v16  ;;  %vm19_vm7 = vcmask 253952   ;;  %vm113_vm8 = vcmask 64512   ;;  %s235_s0 = smov [#allocation5]   ;;  %s183_s21 = sshll.u32 %s282_s2, 4  ;;  %s184_s21 = int_to_ptr.hbm [resolvable:$true] %s183_s21 }
   0x5   :  { %20 = vst.msk [vmem:[#allocation4] sm:$0x1] %vm19_vm7, %v233_v5  ;;  %s181_s1 = sshll.u32 %s235_s0, 4  ;;  %s182_s1 = int_to_ptr.vmem [resolvable:$true] %s181_s1 }
   0x6   :  { %44 = vmatpush.msra.mxu0 %v23_v4 }
   0x8   :  { %45 = vmatpush.msra.mxu0 %v22_v6  ;;  %v50_v14 = vld [vmem:[#allocation2] sm:$0x1] }
   0x9   :  { %192 = vmatmul.msk.f32.vlgmr.msra.gmra.mxu0 %vm26_vm1, %v21_v2  ;;  %v69_v30 = vld [vmem:[#allocation3] sm:$0x1] }
   0xc   :  { %v137_v49 = vld [vmem:[#allocation4] sm:$0x1] }
  0x86   :  { %v47_v7 = vpop.f32.mrf.mxu0 }
  0x87   :  { %v52_v8 = vsel %vm51_vm2, %v47_v7, -inf }
  0x88   :  { %v53_v9 = vrot.slane %v52_v8, 4 }
  0x8a   :  { %v54_v10 = vmax.f32 %v52_v8, %v53_v9 }
  0x8c   :  { %v55_v11 = vrot.slane %v54_v10, 2 }
  0x8e   :  { %v56_v12 = vmax.f32 %v54_v10, %v55_v11 }
  0x90   :  { %v57_v13 = vrot.slane %v56_v12, 1 }
  0x92   :  { %v58_v15 = vmax.f32 %v56_v12, %v57_v13 }
  0x94   :  { %v59_v17 = vmax.f32 %v50_v14, %v58_v15 }
  0x96   :  { %v64_v18 = vperm.slane %v59_v17, 0  ;;  %148 = vst.msk [vmem:[#allocation2] sm:$0x1] %vm16_vm0, %v59_v17  ;;  %v60_v21 = vsub.f32 %v50_v14, %v59_v17 }
  0x98   :  { %v66_v19 = vsub.f32 %v47_v7, %v64_v18  ;;  %v61_v22 = vmul.f32 1.442695, %v60_v21 }
  0x9a   :  { %v67_v20 = vmul.f32 1.442695, %v66_v19 }
  0x9c   :  { %200 = vpow2.f32 %v67_v20 }
  0x9d   :  { %202 = vpow2.f32 %v61_v22 }
  0xa2   :  { %v201_v23 = vpop.eup %200 }
  0xa3   :  { %v71_v24 = vsel %vm51_vm2, %v201_v23, 0.0  ;;  %81 = vxpose.xlu0.b32.start.end [1/1] (short) (narrow) %v201_v23, 8  ;;  %v203_v29 = vpop.eup %202 }
  0xa4   :  { %v72_v25 = vrot.slane %v71_v24, 4  ;;  %v70_v32 = vmul.f32 %v203_v29, %v69_v30 }
  0xa6   :  { %v73_v26 = vadd.f32 %v72_v25, %v71_v24 }
  0xa8   :  { %v74_v27 = vrot.slane %v73_v26, 2 }
  0xaa   :  { %v75_v28 = vadd.f32 %v74_v27, %v73_v26 }
  0xac   :  { %v76_v31 = vrot.slane %v75_v28, 1 }
  0xae   :  { %v77_v33 = vadd.f32 %v76_v31, %v75_v28 }
  0xb0   :  { %v78_v34 = vadd.f32 %v77_v33, %v70_v32 }
  0xb2   :  { %80 = vst.msk [vmem:[#allocation3] sm:$0x1] %vm16_vm0, %v78_v34 }
  0xb9   :  { %v152_v35 = vld [vmem:[#allocation3] sm:$0x1] }
  0xba   :  { %204 = vrcp.f32 %v152_v35  ;;  %v164_v39 = vand.u32 2147483648, %v152_v35  ;;  %v162_v41 = vand.u32 2147483647, %v152_v35  ;;  %vm158_vm4 = vweird.f32 %v152_v35 }
  0xbc   :  { %v165_v43 = vor.u32 1.1754944e-38, %v164_v39  ;;  %vm163_vm6 = vcmp.eq.f32.partialorder %v162_v41, 8.507059e+37 }
  0xc0   :  { %v205_v36 = vpop.eup %204 }
  0xc1   :  { %v154_v37 = vmul.f32 %v205_v36, %v152_v35  ;;  %vm159_vm3 = vweird.f32 %v205_v36 }
  0xc2   :  { %vm160_vm5 = vmor %vm158_vm4, %vm159_vm3 }
  0xc3   :  { %v155_v38 = vsub.f32 1.0, %v154_v37 }
  0xc5   :  { %v156_v40 = vmul.f32 %v205_v36, %v155_v38 }
  0xc7   :  { %v157_v42 = vadd.f32 %v205_v36, %v156_v40 }
  0xc9   :  { %v161_v44 = vsel %vm160_vm5, %v205_v36, %v157_v42 }
  0xca   :  { %v166_v45 = vsel %vm163_vm6, %v165_v43, %v161_v44 }
  0xcb   :  { %170 = vperm.xlu1 %199, %v166_v45  }
 0x10a   :  { %198 = vset.pattern.permute.xlu0 %v234_v16 }
 0x111   :  { %140 = vperm.xlu0 %198, %v203_v29  }
 0x13d   :  { %v171_v53 = vpop.permute.xlu1 %170 }
 0x13e   :  { %v173_v54 = vperm.slane %v171_v53, 0 }
 0x147   :  { %v97_v46 = vpop.trf.xlu0 }
 0x148   :  { %193 = vmatmul.msk.f32.vlgmr.msra.gmra.mxu1 %vm113_vm8, %v97_v46 }
 0x183   :  { %v141_v47 = vpop.permute.xlu0 %140 }
 0x184   :  { %v143_v48 = vperm.slane %v141_v47, 0 }
 0x186   :  { %v144_v50 = vmul.f32 %v143_v48, %v137_v49 }
 0x1c5   :  { %v134_v51 = vpop.f32.mrf.mxu1 }
 0x1c6   :  { %v145_v52 = vadd.f32 %v144_v50, %v134_v51 }
 0x1c8   :  { %147 = vst.msk [vmem:[#allocation4] sm:$0x1] %vm19_vm7, %v145_v52 }
 0x1cf   :  { %v167_v55 = vld [vmem:[#allocation4] sm:$0x1] }
 0x1d0   :  { %v174_v56 = vmul.f32 %v173_v54, %v167_v55 }
 0x1d2   :  { %175 = vst.msk [vmem:[#allocation5] sm:$0x1] %vm19_vm7, %v174_v56 }
 0x1d3   :  { %186 = dma.vmem_to_hbm [thread:$0]  %s182_s1, 16, %s184_s21, [#allocation6]  }
 0x1d4   :  { %230 = dma.done.wait [#allocation6], 16  }
 0x1d5   :  { %231 = vsyncadd [#allocation6], 4294967280 }
 0x1d6   :  { %191 = vsyncpa [#allocation6], 1 }

</bundles_post_ra>
